<compile_context>
chip_gen: v6e
topology: v6e:2x2x1
jax: 0.10.0
libtpu: 0.0.40
codegen_flags: <defaults>
</compile_context>

<pallas_src>
import functools

import jax
import jax.numpy as jnp
import numpy as np
from jax.experimental import pallas as pl
from jax.experimental.pallas import tpu as pltpu


def _temporal_encoder_kernel(x_ref, w_ref, b_ref, o_ref, *, n_mm):
    """One (batch, HW-tile) block: fused 1x1 conv + temporal reduction.

    x_ref : (1, Cin*T, HWt)          dense input slab (C*T sublanes, HW lanes)
    w_ref : (n_mm, Cout_eff, Cin*T)  folded weight(s) (full array, resident)
    b_ref : (Cout_eff, 1)            bias, broadcasts over the lane axis
    o_ref : (1, Cout_eff, HWt)       dense output slab
    n_mm  : 1 for mean/concat (reduction folded into the weight), T for max.
    """
    x = x_ref[0]
    f = jnp.dot(w_ref[0], x, preferred_element_type=jnp.float32)
    for t in range(1, n_mm):
        f = jnp.maximum(f, jnp.dot(w_ref[t], x, preferred_element_type=jnp.float32))
    o_ref[0] = (f + b_ref[...]).astype(o_ref.dtype)


def _sublane_quantum(itemsize):
    # Sub-32-bit dtypes pack along sublanes: 8 rows/f32, 16/bf16, 32/int8.
    return {4: 8, 2: 16, 1: 32}.get(int(itemsize), 8)


def _pad_up(n, q):
    return ((n + q - 1) // q) * q


def _tpu_vmem_capacity_bytes():
    """Physical VMEM of the local TPU generation (64 MiB on v7x, 128 MiB on
    v5e/v6e).  Falls back to the conservative 64 MiB if the query fails."""
    try:
        cap = int(pltpu.get_tpu_info().vmem_capacity_bytes)
        if cap >= 16 * 1024 * 1024:
            return cap
    except Exception:
        pass
    return 64 * 1024 * 1024


def _pick_hw_tile(HW, cin_t, cout_eff, n_mm, in_itemsize, out_itemsize,
                  w_itemsize, vmem_budget_bytes, max_tile=32768):
    """Largest lane-dense (multiple-of-128) HW tile whose double-buffered
    input/output blocks plus the resident weight/bias blocks (with sublane
    padding) fit the VMEM budget."""
    if HW <= 128:
        return HW  # full-extent block is always legal

    q_in = _sublane_quantum(in_itemsize)
    q_out = _sublane_quantum(out_itemsize)
    q_w = _sublane_quantum(w_itemsize)
    # Tile-size-independent footprint: weight + bias blocks (double-buffered)
    # plus slack for compiler-internal scratch.
    fixed = (2 * n_mm * _pad_up(cout_eff, q_w) * _pad_up(cin_t, 128) * w_itemsize
             + 2 * _pad_up(cout_eff, 8) * 128 * 4
             + (1 << 20))

    def footprint(hwt):
        x_blk = _pad_up(cin_t, q_in) * hwt * in_itemsize
        o_blk = _pad_up(cout_eff, q_out) * hwt * out_itemsize
        return fixed + 2 * (x_blk + o_blk)     # double-buffered input + output

    cap = min((HW // 128) * 128, max_tile)
    best = 128
    hwt = 128
    while hwt <= cap:
        if footprint(hwt) <= vmem_budget_bytes:
            best = hwt
        hwt += 128
    return best


def temporal_wrapper_forward(x_bcthw, w, b, *, pooling="mean", concat=False,
                             compute_dtype=jnp.float32, out_dtype=jnp.float32):
    """Equivalent of TemporalWrapper(encoder=1x1 conv, pooling=..., concat=...).

    Args:
      x_bcthw: [B, C_in, T, H, W] input (PyTorch axis convention).
      w:       [C_in, C_out] 1x1-conv weight (per-pixel matmul).
      b:       [C_out] bias.
      pooling: 'mean' or 'max' temporal pooling (ignored when concat=True,
               matching the PyTorch module).
      concat:  concatenate per-timestep features along channels instead of
               pooling (channel-major c*T+t order, as torch.stack(dim=2).view).
      compute_dtype: kernel input/weight dtype.  jnp.bfloat16 halves the HBM
        read traffic of this memory-bound kernel; accumulation is f32 either
        way, but numerics change -- clear with the model owner first.
      out_dtype: output dtype (bf16 halves the dominant write stream).
    Returns:
      list with a single feature map:
        [B, C_out, H, W]     if not concat (mean/max pooled over T)
        [B, C_out*T, H, W]   if concat.
    """
    if pooling not in ("mean", "max"):
        raise ValueError("Pooling must be 'mean' or 'max'")
    if x_bcthw.ndim != 5:
        raise ValueError(f"Expected input shape [B, C, T, H, W], got {x_bcthw.shape}")
    B, C, T, H, W = x_bcthw.shape
    if T < 1:
        raise ValueError("TemporalWrapper requires at least one timestep (T >= 1)")
    Cin, Cout = w.shape
    if Cin != C:
        raise ValueError(f"Weight C_in {Cin} does not match input channels {C}")
    HW = H * W
    cin_t = Cin * T

    # Free view: merge the adjacent contiguous (C, T) and (H, W) axes.
    x = x_bcthw.reshape(B, cin_t, HW).astype(compute_dtype)

    # Fold the temporal reduction / concat into the (tiny) weight once.
    wt = jnp.transpose(w).astype(jnp.float32)              # (Cout, Cin)
    if concat:
        eye = jnp.eye(T, dtype=jnp.float32)
        # w_eff[c*T + t, k*T + s] = W[k, c] * (t == s)  -> torch stack+view order
        w_eff = jnp.einsum("ck,ts->ctks", wt, eye).reshape(1, Cout * T, cin_t)
        b_eff = jnp.repeat(b.astype(jnp.float32), T).reshape(Cout * T, 1)
        n_mm, cout_eff = 1, Cout * T
    elif pooling == "mean":
        # mean_t(x_t @ W) == (repeat(W^T, T)/T) @ x_flat : one MXU contraction.
        w_eff = (jnp.repeat(wt, T, axis=1) / T).reshape(1, Cout, cin_t)
        b_eff = b.astype(jnp.float32).reshape(Cout, 1)
        n_mm, cout_eff = 1, Cout
    else:  # max
        eye = jnp.eye(T, dtype=jnp.float32)
        # w_eff[t, c, k*T + s] = W[k, c] * (t == s); bias hoisted out of max.
        w_eff = jnp.einsum("ck,ts->tcks", wt, eye).reshape(T, Cout, cin_t)
        b_eff = b.astype(jnp.float32).reshape(Cout, 1)
        n_mm, cout_eff = T, Cout
    w_eff = w_eff.astype(compute_dtype)

    # Generation-aware tiling (64 MiB VMEM on v7x vs 128 MiB on v5e/v6e).
    vmem_cap = _tpu_vmem_capacity_bytes()
    hwt = _pick_hw_tile(
        HW, cin_t, cout_eff, n_mm,
        jnp.dtype(compute_dtype).itemsize, jnp.dtype(out_dtype).itemsize,
        jnp.dtype(compute_dtype).itemsize, int(vmem_cap * 0.65))
    n_hw = -(-HW // hwt)
    # v7x has 2 TensorCores per chip: keep the 'parallel' grid >= 2 steps.
    while B * n_hw < 2 and hwt > 128:
        hwt = max(128, (hwt // 2) // 128 * 128)
        n_hw = -(-HW // hwt)

    kernel = functools.partial(_temporal_encoder_kernel, n_mm=n_mm)

    out = pl.pallas_call(
        kernel,
        out_shape=jax.ShapeDtypeStruct((B, cout_eff, HW), out_dtype),
        grid_spec=pltpu.PrefetchScalarGridSpec(
            num_scalar_prefetch=0,
            grid=(B, n_hw),
            in_specs=[
                pl.BlockSpec((1, cin_t, hwt), lambda bi, hi: (bi, 0, hi)),
                pl.BlockSpec((n_mm, cout_eff, cin_t), lambda bi, hi: (0, 0, 0)),
                pl.BlockSpec((cout_eff, 1), lambda bi, hi: (0, 0)),
            ],
            out_specs=pl.BlockSpec((1, cout_eff, hwt), lambda bi, hi: (bi, 0, hi)),
        ),
        compiler_params=pltpu.CompilerParams(
            dimension_semantics=("parallel", "parallel"),
            vmem_limit_bytes=int(vmem_cap * 0.85),
        ),
    )(x, w_eff, b_eff)

    # Split the lane axis back into (H, W): contiguous split, free.
    if concat:
        return [out.reshape(B, Cout * T, H, W)]
    return [out.reshape(B, Cout, H, W)]


def _reference_forward(x_bcthw, w, b, pooling="mean", concat=False):
    """Pure-JAX reference matching the PyTorch semantics."""
    B, C, T, H, W = x_bcthw.shape
    feats = []
    for t in range(T):
        xt = x_bcthw[:, :, t, :, :]  # [B, C, H, W]
        f = jnp.einsum("bchw,co->bohw", xt, w) + b[None, :, None, None]
        feats.append(f)
    stacked = jnp.stack(feats, axis=2)  # [B, Cout, T, H, W]
    if concat:
        return [stacked.reshape(B, -1, H, W)]
    if pooling == "max":
        return [jnp.max(stacked, axis=2)]
    return [jnp.mean(stacked, axis=2)]


if __name__ == "__main__":
    B, Cin, T, H, W = 2, 4, 3, 16, 16
    Cout = 8  # encoder.out_channels

    key = jax.random.PRNGKey(0)
    kx, kw, kb = jax.random.split(key, 3)
    x = jax.random.normal(kx, (B, Cin, T, H, W), dtype=jnp.float32)
    w = jax.random.normal(kw, (Cin, Cout), dtype=jnp.float32) * 0.1
    bias = jax.random.normal(kb, (Cout,), dtype=jnp.float32) * 0.1

    # All three modes (concat=True ignores pooling, as in the PyTorch module).
    for pooling, concat in (("mean", False), ("max", False),
                            ("mean", True), ("max", True)):
        out = temporal_wrapper_forward(x, w, bias, pooling=pooling, concat=concat)
        out = [jax.block_until_ready(o) for o in out]
        ref = _reference_forward(x, w, bias, pooling=pooling, concat=concat)
        np.testing.assert_allclose(
            np.asarray(out[0]), np.asarray(ref[0]), rtol=1e-5, atol=1e-5
        )
        assert out[0].shape == ref[0].shape

    # Non-multiple-of-128 spatial size exercises the masked tail tile path
    # (replaces the old single-full-HW fallback).
    x2 = jax.random.normal(kx, (1, Cin, T, 12, 12), dtype=jnp.float32)
    out2 = jax.block_until_ready(
        temporal_wrapper_forward(x2, w, bias, pooling="mean")[0])
    ref2 = _reference_forward(x2, w, bias, pooling="mean")[0]
    np.testing.assert_allclose(np.asarray(out2), np.asarray(ref2),
                               rtol=1e-5, atol=1e-5)

    # bf16 compute / output path (memory-traffic halving option).
    out3 = jax.block_until_ready(
        temporal_wrapper_forward(x, w, bias, pooling="mean",
                                 compute_dtype=jnp.bfloat16,
                                 out_dtype=jnp.bfloat16)[0])
    ref3 = _reference_forward(x, w, bias, pooling="mean")[0]
    np.testing.assert_allclose(np.asarray(out3, dtype=np.float32),
                               np.asarray(ref3), rtol=5e-2, atol=5e-2)

    print("KERNEL_OK")
</pallas_src>

<mosaic_0001>
module attributes {stable_mosaic.version = 11 : i64} {
  func.func @_temporal_encoder_kernel(%arg0: i32, %arg1: i32, %arg2: memref<1x12x256xf32, #tpu.memory_space<vmem>>, %arg3: memref<1x8x12xf32, #tpu.memory_space<vmem>>, %arg4: memref<8x1xf32, #tpu.memory_space<vmem>>, %arg5: memref<1x8x256xf32, #tpu.memory_space<vmem>>) attributes {dimension_semantics = [#tpu.dimension_semantics<parallel>, #tpu.dimension_semantics<parallel>], iteration_bounds = array<i64: 2, 1>, scalar_prefetch = 0 : i64, scratch_operands = 0 : i64, tpu.core_type = #tpu.core_type<tc>, window_params = [{transform_indices = @transform_0, window_bounds = array<i64: 1, 12, 256>}, {pipeline_mode = #tpu.pipeline_mode<synchronous>, transform_indices = @transform_1, window_bounds = array<i64: 1, 8, 12>}, {pipeline_mode = #tpu.pipeline_mode<synchronous>, transform_indices = @transform_2, window_bounds = array<i64: 8, 1>}, {transform_indices = @transform_3, window_bounds = array<i64: 1, 8, 256>}]} {
    %c0 = arith.constant 0 : index
    %c0_0 = arith.constant 0 : index
    %c0_1 = arith.constant 0 : index
    %0 = vector.load %arg2[%c0, %c0_0, %c0_1] : memref<1x12x256xf32, #tpu.memory_space<vmem>>, vector<1x12x256xf32>
    %1 = vector.shape_cast %0 : vector<1x12x256xf32> to vector<12x256xf32>
    %c0_2 = arith.constant 0 : index
    %c0_3 = arith.constant 0 : index
    %c0_4 = arith.constant 0 : index
    %2 = vector.load %arg3[%c0_2, %c0_3, %c0_4] : memref<1x8x12xf32, #tpu.memory_space<vmem>>, vector<1x8x12xf32>
    %3 = vector.shape_cast %2 : vector<1x8x12xf32> to vector<8x12xf32>
    %cst = arith.constant dense<0.000000e+00> : vector<8x256xf32>
    %4 = tpu.matmul %3, %1, %cst {dimension_numbers = #tpu.dot_dimension_numbers<[1], [0], [0], [1], [0, 0, 1, 1], [], []>} : vector<8x12xf32>, vector<12x256xf32>, vector<8x256xf32> -> vector<8x256xf32>
    %c0_5 = arith.constant 0 : index
    %c0_6 = arith.constant 0 : index
    %5 = vector.load %arg4[%c0_5, %c0_6] : memref<8x1xf32, #tpu.memory_space<vmem>>, vector<8x1xf32>
    %6 = vector.broadcast %5 : vector<8x1xf32> to vector<8x256xf32>
    %7 = arith.addf %4, %6 : vector<8x256xf32>
    %c0_7 = arith.constant 0 : index
    %c0_8 = arith.constant 0 : index
    %c0_9 = arith.constant 0 : index
    %8 = vector.load %arg5[%c0_7, %c0_8, %c0_9] : memref<1x8x256xf32, #tpu.memory_space<vmem>>, vector<1x8x256xf32>
    %9 = vector.shape_cast %8 : vector<1x8x256xf32> to vector<8x256xf32>
    %10 = vector.shape_cast %7 : vector<8x256xf32> to vector<1x8x256xf32>
    tpu.vector_store %arg5[%c0_7, %c0_8, %c0_9], %10 {strides = array<i32>} : memref<1x8x256xf32, #tpu.memory_space<vmem>>, vector<1x8x256xf32>,
    return
  }
  func.func @transform_0(%arg0: i32, %arg1: i32) -> (i32, i32, i32) {
    %c0_i32 = arith.constant 0 : i32
    %c0_i32_0 = arith.constant 0 : i32
    return %arg0, %c0_i32, %arg1 : i32, i32, i32
  }
  func.func @transform_1(%arg0: i32, %arg1: i32) -> (i32, i32, i32) {
    %c0_i32 = arith.constant 0 : i32
    %c0_i32_0 = arith.constant 0 : i32
    %c0_i32_1 = arith.constant 0 : i32
    %c0_i32_2 = arith.constant 0 : i32
    return %c0_i32, %c0_i32_0, %c0_i32_1 : i32, i32, i32
  }
  func.func @transform_2(%arg0: i32, %arg1: i32) -> (i32, i32) {
    %c0_i32 = arith.constant 0 : i32
    %c0_i32_0 = arith.constant 0 : i32
    %c0_i32_1 = arith.constant 0 : i32
    return %c0_i32, %c0_i32_0 : i32, i32
  }
  func.func @transform_3(%arg0: i32, %arg1: i32) -> (i32, i32, i32) {
    %c0_i32 = arith.constant 0 : i32
    %c0_i32_0 = arith.constant 0 : i32
    return %arg0, %c0_i32, %arg1 : i32, i32, i32
  }
}

</mosaic_0001>

<bundles_post_ra>
// kernel: tpu_custom_call.1
= control target key start
LH: loop header
LB: loop body
LE: loop exit
PB: predicated region body
PF: predicated region fallthrough
CT: control target
= control target key end

     0   :  { %8 = vsyncpa [#allocation3], 0  ;;  %s670_s0 = inlined_call_operand.vmem [shape: f32[2,12,256], index: 0, kind: input, shape index: {}]   ;;  %s671_s1 = inlined_call_operand.vmem [shape: f32[1,8,12], index: 1, kind: input, shape index: {}]   ;;  %s672_s2 = inlined_call_operand.vmem [shape: f32[8,1], index: 2, kind: input, shape index: {}]   ;;  %s673_s3 = inlined_call_operand.hbm [shape: f32[2,8,256], index: 3, kind: output, shape index: {}]  }
   0x1   :  { %10 = vsyncpa [#allocation3 + $0x1], 0  ;;  %s565_s12 = smov 0   ;;  %s567_s13 = smov 0  }
   0x2   :  { %s569_s14 = smov 0   ;;  %s571_s15 = smov 0  }
   0x3   :  { %s573_s16 = smov 0   ;;  %s575_s17 = smov 0  }
   0x4 LB: > { %s388_s18 = sadd.s32 4294967295, %s540_s17   ;;  %s389_s19 = sadd.s32 4294967294, %s540_s17   ;;  %s540_s17 = sphi %s575_s17, %s16_s17   ;;  %s536_s16 = sphi %s573_s16, %s680_s16   ;;  %s532_s15 = sphi %s571_s15, %s679_s15   ;;  %s528_s14 = sphi %s569_s14, %s678_s14   ;;  %s524_s13 = sphi %s567_s13, %s677_s13   ;;  %s520_s12 = sphi %s565_s12, %s676_s12  }
   0x5   : > { %s28_s20 = sadd.s32 1, %s536_s16  ;;  %s107_s21 = sadd.s32 1, %s528_s14 }
   0x6   : > { %p30_p0 = scmp.ge.s32.totalorder %s28_s20, 2  ;;  %p117_p1 = scmp.ne.s32.totalorder %s528_s14, %s524_s13 }
   0x7   : > { %p118_p2 = scmp.eq.s32.totalorder %s388_s18, 1  ;;  %p123_p3 = scmp.ne.s32.totalorder %s524_s13, %s520_s12 }
   0x8   : > { %s682_s20 = smov (%p30_p0, %s28_s20), 0  ;;  %p124_p5 = scmp.eq.s32.totalorder %s389_s19, 1 }
   0x9   : > { %p605_p4 = por %p118_p2, %p117_p1  ;;  %s102_s23 = ssub.s32 %s536_s16, %s682_s20 }
   0xa   : > { %p392_p6 = scmp.ge.s32.totalorder %s540_s17, 1  ;;  %p105_p7 = scmp.eq.s32.totalorder %s102_s23, 0 }
   0xb   : > { %p612_p8 = por %p124_p5, %p123_p3  ;;  %p161_p9 = scmp.lt.s32.totalorder %s540_s17, 3 }
   0xc   : > { %s618_s25 = scalar_select %p105_p7, %s528_s14, %s107_s21  }
   0xd   : > { %p162_p10 = pnand %p392_p6, %p161_p9 }
   0xe   : > { %p190_p11 = scmp.lt.s32.totalorder (!%p162_p10), %s532_s15, 1  ;;  %s186_s8 = sand.u32 (!%p162_p10), 1, %s524_s13  }
   0xf   : > { %165 = sbr.rel (%p162_p10) target bundleno = 239 (0xef), region = 32  ;;  %s393_s9 = sshll.u32 (!%p162_p10), %s186_s8, 4 }
  0x10   : > { %s405_s10 = sshll.u32 (!%p162_p10), %s532_s15, 8  ;;  %s188_s11 = scalar_lea.vmem (!%p162_p10), [#allocation2], %s393_s9 }
  0x11   : > { %s312_s18 = sshll.u32 (!%p162_p10), %s188_s11, 4  ;;  %s310_s23 = scalar_lea.hbm (!%p162_p10), %s673_s3, %s405_s10  ;;  %s313_s18 = int_to_ptr.vmem [resolvable:$true] %s312_s18 }
  0x12   : > { %s296_s26 = scalar_lea.sflag (!%p162_p10), [#allocation3], %s186_s8  ;;  %s464_s27 = scalar_lea.vmem (!%p162_p10), %s313_s18, 256 }
  0x13   : > { %p465_p12 = scmp.ne.s32.totalorder (!%p162_p10), %s313_s18, %s464_s27 }
  0x14   : > { %v542_v0 = vmov 0.0   ;;  %v543_v1 = vmov 0   ;;  %v205_v2 = vld [vmem:[%s672_s2] sm:$0xff]  ;;  %s191_s28 = scalar_select %p190_p11, %s532_s15, 1  ;;  %vm215_vm0 = vcmask 1043456   ;;  %vm211_vm1 = vcmask 97280  }
  0x15   : > { %286 = vmatprep.mubr.f32.mxu0 %v542_v0  ;;  %463 = vset.pattern.permute.xlu0 %v543_v1  ;;  %v204_v7 = vld [vmem:[%s671_s1] sm:$0xff]  ;;  %p466_p13 = pnand %p465_p12, %p605_p4 }
  0x16   : > { %208 = vperm.xlu0 %463, %v205_v2   ;;  %s404_s29 = sshll.u32 %s191_s28, 5  ;;  %s544_s28 = smov [#allocation2]  }
  0x17   : > { %s197_s5 = scalar_lea.vmem %s670_s0, %s404_s29  ;;  %p467_p0 = pneg %p466_p13 }
  0x18   : > { %v203_v3 = vld [vmem:[%s197_s5 + $0x18] sm:$0xf]  ;;  %v202_v4 = vld [vmem:[%s197_s5 + $0x10] sm:$0xf]  ;;  %v201_v5 = vld [vmem:[%s197_s5 + $0x8] sm:$0xff]  ;;  %s468_s15 = sshll.u32 %s544_s28, 4  ;;  %s469_s15 = int_to_ptr.vmem [resolvable:$false] %s468_s15 }
  0x19   : > { %396 = vmatprep.subr.msk.mxu0 %vm215_vm0, %v203_v3  ;;  %v200_v6 = vld [vmem:[%s197_s5] sm:$0xff]  ;;  %s470_s29 = scalar_lea.vmem %s469_s15, 512  ;;  %p471_p1 = scmp.lt.s32.totalorder %s313_s18, %s469_s15 }
  0x1a   : > { %397 = vmatpush1.msk.msra.mxu0 %vm215_vm0, %v202_v4  ;;  %p472_p2 = scmp.lt.s32.totalorder %s470_s29, %s464_s27 }
  0x1b   : > { %252 = vmatprep.subr.mxu0 %v201_v5 }
  0x1c   : > { %253 = vmatpush1.msra.mxu0 %v200_v6  ;;  %p473_p3 = por %p472_p2, %p471_p1 }
  0x1d   : > { %398 = vmatmul.mubr.msk.f32.vlgmr.msra.gmra.mxu0 %vm211_vm1, %v204_v7 }
  0x1e   : > { %p474_p5 = pnand %p473_p3, %p467_p0 }
  0x91   : > { %v209_v8 = vpop.permute.xlu0 %208 }
  0xdd   : > { %v288_v9 = vpop.f32.mrf.mxu0 }
  0xde   : > { %v289_v10 = vadd.f32 %v288_v9, %v209_v8 }
  0xdf   : > { %v290_v11 = vpop.f32.mrf.mxu0 }
  0xe0   : > { %293 = vst [vmem:[%s188_s11] sm:$0xff] %v289_v10  ;;  %v291_v12 = vadd.f32 %v290_v11, %v209_v8 }
  0xe2   : > { %294 = vst [vmem:[%s188_s11 + $0x8] sm:$0xff] %v291_v12 }
  0xe3   : > { %477 = shalt.err (!%p474_p5)
}
  0xe4   : > { %s478_s30 = scalar_lea.hbm %s310_s23, 256  ;;  %s482_s6 = scalar_lea.hbm %s673_s3, 512 }
  0xe5   : > { %p479_p6 = scmp.ne.s32.totalorder %s310_s23, %s478_s30  ;;  %p483_p10 = scmp.lt.s32.totalorder %s310_s23, %s673_s3 }
  0xe6   : > { %p484_p11 = scmp.lt.s32.totalorder %s482_s6, %s478_s30 }
  0xe7   : > { %p480_p7 = pnand %p479_p6, %p605_p4 }
  0xe8   : > { %p485_p12 = por %p484_p11, %p483_p10 }
  0xe9   : > { %p481_p9 = pneg %p480_p7 }
  0xeb   : > { %p486_p13 = pnand %p485_p12, %p481_p9 }
  0xed   : > { %489 = shalt.err (!%p486_p13)
}
  0xee   : > { %406 = dma.vmem_to_hbm [thread:$0]  (%p605_p4), %s313_s18, 256, %s310_s23, %s296_s26  }
  0xef PF: > { %p412_p0 = scmp.ge.s32.totalorder %s540_s17, 2  ;;  %s324_s9 = sand.u32 1, %s520_s12  }
  0xf0   : > { %s325_s10 = scalar_lea.sflag [#allocation3], %s324_s9 }
  0xf1   : > { %p409_p1 = pnand %p412_p0, %p612_p8 }
  0xf3   : > { %p410_p2 = pneg %p409_p1 }
  0xf5   : > { %515 = dma.done.wait (%p410_p2), %s325_s10, 256  }
  0xf6   : > { %517 = vsyncadd (%p410_p2), %s325_s10, 4294967040  ;;  %s16_s17 = sadd.s32 1, %s540_s17   ;;  %s676_s12 = smov %s524_s13 }
  0xf7   : > { %p13_p3 = scmp.ge.s32.totalorder %s16_s17, 4   ;;  %s677_s13 = smov %s528_s14 }
  0xf8   : > { %s678_s14 = smov %s618_s25  ;;  %s679_s15 = smov %s536_s16 }
  0xf9   : > { %s680_s16 = smov %s682_s20  ;;  %15 = sbr.rel (!%p13_p3) target bundleno = 4 (0x4), region = 67 }
  0xfe   :  { %330 = vsyncpa [#allocation3], 1 }
  0xff   :  { %332 = vsyncpa [#allocation3 + $0x1], 1 }

</bundles_post_ra>
